<compile_context>
chip_gen: v6e
topology: v6e:2x2x1
jax: 0.10.0
libtpu: 0.0.40
codegen_flags: <defaults>
</compile_context>

<pallas_src>
import jax
import jax.numpy as jnp
from jax.experimental import pallas as pl
from jax.experimental.pallas import tpu as pltpu


def _round_up(x, m):
    return ((x + m - 1) // m) * m


def mlp_kernel(x_ref, w1_ref, b1_ref, w2_ref, b2_ref, o_ref, acc_ref):
    """One (batch-tile i, hidden-tile j) grid step of relu(x@w1+b1) @ w2 + b2."""
    j = pl.program_id(1)

    @pl.when(j == 0)
    def _():
        acc_ref[...] = jnp.zeros_like(acc_ref)

    # fc1 partial: [tb, F] @ [F, tH] -> f32 [tb, tH] on the MXU.
    h = jnp.dot(x_ref[...], w1_ref[...], preferred_element_type=jnp.float32)
    # Bias + ReLU are elementwise per hidden column -> exact under H tiling.
    h = jnp.maximum(h + b1_ref[...], 0.0)
    # fc3 partial contraction over this H tile, accumulated in f32 VMEM.
    # (Cast h to the weight dtype: no-op for f32, bf16 when use_bf16=True.)
    acc_ref[...] += jnp.dot(h.astype(w2_ref.dtype), w2_ref[...],
                            preferred_element_type=jnp.float32)

    @pl.when(j == pl.num_programs(1) - 1)
    def _():
        o_ref[...] = (acc_ref[...] + b2_ref[...]).astype(o_ref.dtype)


def _spec(shape, index_map, bufs):
    """BlockSpec helper: only attach pipeline_mode when non-default."""
    if bufs == 2:
        return pl.BlockSpec(shape, index_map)
    return pl.BlockSpec(shape, index_map, pipeline_mode=pl.Buffered(bufs))


def net_forward(x, w1, b1, w2, b2, *, block_b=512, block_h=512,
                use_bf16=False, x_buffers=2, interpret=False):
    """Fused forward pass: relu(x @ w1 + b1) @ w2 + b2.

    x : [B, F];  w1: [F, H], b1: [1, H];  w2: [H, O], b2: [1, O]
    returns [B, O] in x's original dtype.

    block_b : batch tile (rounded to sublane packing; 512-1024 sweet spot;
              on v7x keep weights + 2*tb*(F+O_pad) under ~48 MiB per core and
              prefer an even number of batch tiles across the 2 TensorCores).
    block_h : hidden-dim (reduction) tile, rounded to a multiple of 128.
    use_bf16: cast x/w1/w2 to bf16 for the MXU (recommended at real sizes on
              v6e/v7x); bias/ReLU/accumulation stay f32.
    x_buffers: pipeline depth for the streamed x tiles (3 can help on v5e,
              which has the most VMEM headroom relative to its HBM BW).
    """
    B, F = x.shape
    Fw, H = w1.shape
    Hw, O = w2.shape
    assert Fw == F and Hw == H and b1.shape == (1, H) and b2.shape == (1, O)
    out_dtype = x.dtype

    if use_bf16:
        x = x.astype(jnp.bfloat16)
        w1 = w1.astype(jnp.bfloat16)
        w2 = w2.astype(jnp.bfloat16)
    b1 = b1.astype(jnp.float32)
    b2 = b2.astype(jnp.float32)

    # ---- tiles ------------------------------------------------------------
    min_b = 16 if use_bf16 else 8                       # sublane packing
    tb = max(min_b, (min(block_b, B) // min_b) * min_b)

    tH = max(128, (min(block_h, _round_up(H, 128)) // 128) * 128)
    H_pad = _round_up(H, tH)     # tH divides H_pad exactly: the reduction dim
    O_pad = _round_up(O, 128)    # must never see an out-of-bounds tile.

    # ---- lane-dense zero padding of the (small) weights only --------------
    # Padded hidden units: relu(x@0 + 0) = 0 and the matching w2 rows are 0,
    # so they contribute exactly nothing.  Padded output columns are sliced
    # off at the end.  x itself is streamed unpadded.
    if H_pad != H:
        w1 = jnp.pad(w1, ((0, 0), (0, H_pad - H)))
        b1 = jnp.pad(b1, ((0, 0), (0, H_pad - H)))
        w2 = jnp.pad(w2, ((0, H_pad - H), (0, 0)))
    if O_pad != O:
        w2 = jnp.pad(w2, ((0, 0), (0, O_pad - O)))
        b2 = jnp.pad(b2, ((0, 0), (0, O_pad - O)))

    nb = pl.cdiv(B, tb)          # partial last batch tile is masked by Pallas
    nh = H_pad // tH

    # Grid-constant blocks get a single VMEM buffer (double buffering a block
    # whose index never changes is dead VMEM).  When H is tiled (nh > 1) the
    # weight tiles are streamed, so they keep the default double buffer.
    w_bufs = 1 if nh == 1 else 2

    # ---- explicit VMEM budget (review: defaults are only 16/32 MiB) -------
    itm_x = jnp.dtype(x.dtype).itemsize
    itm_w = jnp.dtype(w1.dtype).itemsize
    itm_o = jnp.dtype(out_dtype).itemsize
    vmem_need = (
        x_buffers * tb * F * itm_x          # streamed x tiles
        + 2 * tb * O_pad * itm_o            # streamed out tiles
        + w_bufs * F * tH * itm_w           # w1 tile(s)
        + w_bufs * 8 * tH * 4               # b1 tile(s) (sublane-padded)
        + w_bufs * tH * O_pad * itm_w       # w2 tile(s)
        + 1 * 8 * O_pad * 4                 # b2 (single-buffered, constant)
        + tb * O_pad * 4                    # f32 accumulator scratch
    )
    vmem_limit = int(max(min(vmem_need * 1.3 + (1 << 20), 100 * 2**20),
                         16 * 2**20))

    grid_spec = pltpu.PrefetchScalarGridSpec(
        num_scalar_prefetch=0,
        grid=(nb, nh),
        in_specs=[
            _spec((tb, F), lambda i, j: (i, 0), x_buffers),       # x (streamed)
            _spec((F, tH), lambda i, j: (0, j), w_bufs),          # w1
            _spec((1, tH), lambda i, j: (0, j), w_bufs),          # b1
            _spec((tH, O_pad), lambda i, j: (j, 0), w_bufs),      # w2
            _spec((1, O_pad), lambda i, j: (0, 0), 1),            # b2 (const)
        ],
        out_specs=pl.BlockSpec((tb, O_pad), lambda i, j: (i, 0)),
        scratch_shapes=[pltpu.VMEM((tb, O_pad), jnp.float32)],
    )

    out = pl.pallas_call(
        mlp_kernel,
        out_shape=jax.ShapeDtypeStruct((B, O_pad), out_dtype),
        grid_spec=grid_spec,
        compiler_params=pltpu.CompilerParams(
            dimension_semantics=("parallel", "arbitrary"),
            vmem_limit_bytes=vmem_limit,
        ),
        interpret=interpret,
    )(x, w1, b1, w2, b2)

    return out[:, :O] if O_pad != O else out


def init_params(key, n_features, n_hidden, n_output):
    """Deterministic init mimicking PyTorch nn.Linear default
    (uniform in +/- 1/sqrt(fan_in)); weights stored already transposed."""
    k1, k2, k3, k4 = jax.random.split(key, 4)
    bound1 = 1.0 / jnp.sqrt(jnp.float32(n_features))
    bound2 = 1.0 / jnp.sqrt(jnp.float32(n_hidden))
    w1 = jax.random.uniform(k1, (n_features, n_hidden), jnp.float32,
                            minval=-bound1, maxval=bound1)
    b1 = jax.random.uniform(k2, (1, n_hidden), jnp.float32,
                            minval=-bound1, maxval=bound1)
    w2 = jax.random.uniform(k3, (n_hidden, n_output), jnp.float32,
                            minval=-bound2, maxval=bound2)
    b2 = jax.random.uniform(k4, (1, n_output), jnp.float32,
                            minval=-bound2, maxval=bound2)
    return w1, b1, w2, b2


if __name__ == "__main__":
    # Small shapes consistent with the module: batch=64, n_features=16,
    # n_hidden=32, n_output=4.
    B, n_features, n_hidden, n_output = 64, 16, 32, 4

    key = jax.random.PRNGKey(0)
    kx, kp = jax.random.split(key)
    x = jax.random.normal(kx, (B, n_features), jnp.float32)
    w1, b1, w2, b2 = init_params(kp, n_features, n_hidden, n_output)

    # Reference in plain JAX (same math as the PyTorch forward).
    ref = jnp.maximum(x @ w1 + b1, 0.0) @ w2 + b2

    # f32 path, multi-step pipelined batch grid.
    out = jax.block_until_ready(net_forward(x, w1, b1, w2, b2, block_b=16))
    assert out.shape == (B, n_output)
    assert jnp.allclose(out, ref, atol=1e-5, rtol=1e-5)

    # Partial last batch tile (B=64, tb=48 -> 2 tiles, second one masked):
    # exercises the pad-free cdiv grid.
    out_part = jax.block_until_ready(net_forward(x, w1, b1, w2, b2, block_b=48))
    assert jnp.allclose(out_part, ref, atol=1e-5, rtol=1e-5)

    # bf16 MXU path (f32 bias/ReLU/accumulation), looser tolerance: h is
    # downcast to bf16 before the second matmul (documented approximation).
    out_bf16 = jax.block_until_ready(
        net_forward(x, w1, b1, w2, b2, block_b=32, use_bf16=True))
    assert jnp.allclose(out_bf16, ref, atol=5e-2, rtol=5e-2)

    # Larger hidden size to exercise the H-reduction grid axis + accumulator
    # (H=300 -> padded to 384 -> three 128-wide H tiles).
    H2 = 300
    w1b, b1b, w2b, b2b = init_params(jax.random.PRNGKey(1),
                                     n_features, H2, n_output)
    ref2 = jnp.maximum(x @ w1b + b1b, 0.0) @ w2b + b2b
    out2 = jax.block_until_ready(
        net_forward(x, w1b, b1b, w2b, b2b, block_b=32, block_h=128))
    assert out2.shape == (B, n_output)
    assert jnp.allclose(out2, ref2, atol=1e-3, rtol=1e-3)

    print("KERNEL_OK")
</pallas_src>

<mosaic_0001>
module attributes {stable_mosaic.version = 11 : i64} {
  func.func @mlp_kernel(%arg0: i32, %arg1: i32, %arg2: memref<16x16xf32, #tpu.memory_space<vmem>>, %arg3: memref<16x128xf32, #tpu.memory_space<vmem>>, %arg4: memref<1x128xf32, #tpu.memory_space<vmem>>, %arg5: memref<128x128xf32, #tpu.memory_space<vmem>>, %arg6: memref<1x128xf32, #tpu.memory_space<vmem>>, %arg7: memref<16x128xf32, #tpu.memory_space<vmem>>, %arg8: memref<16x128xf32, #tpu.memory_space<vmem>>) attributes {dimension_semantics = [#tpu.dimension_semantics<parallel>, #tpu.dimension_semantics<arbitrary>], iteration_bounds = array<i64: 4, 1>, scalar_prefetch = 0 : i64, scratch_operands = 1 : i64, tpu.core_type = #tpu.core_type<tc>, window_params = [{transform_indices = @transform_0, window_bounds = array<i64: 16, 16>}, {pipeline_mode = #tpu.pipeline_mode<synchronous>, transform_indices = @transform_1, window_bounds = array<i64: 16, 128>}, {pipeline_mode = #tpu.pipeline_mode<synchronous>, transform_indices = @transform_2, window_bounds = array<i64: 1, 128>}, {pipeline_mode = #tpu.pipeline_mode<synchronous>, transform_indices = @transform_3, window_bounds = array<i64: 128, 128>}, {pipeline_mode = #tpu.pipeline_mode<synchronous>, transform_indices = @transform_4, window_bounds = array<i64: 1, 128>}, {transform_indices = @transform_5, window_bounds = array<i64: 16, 128>}]} {
    %c0_i32 = arith.constant 0 : i32
    %0 = arith.cmpi eq, %arg1, %c0_i32 : i32
    %1 = arith.extui %0 : i1 to i32
    %c0_i32_0 = arith.constant 0 : i32
    %2 = arith.cmpi ne, %1, %c0_i32_0 : i32
    scf.if %2 {
      %cst_16 = arith.constant 0.000000e+00 : f32
      %19 = vector.broadcast %cst_16 : f32 to vector<16x128xf32>
      %c0_17 = arith.constant 0 : index
      %c0_18 = arith.constant 0 : index
      %20 = vector.load %arg8[%c0_17, %c0_18] : memref<16x128xf32, #tpu.memory_space<vmem>>, vector<16x128xf32>
      tpu.vector_store %arg8[%c0_17, %c0_18], %19 {strides = array<i32>} : memref<16x128xf32, #tpu.memory_space<vmem>>, vector<16x128xf32>,
    } else {
    }
    %c0 = arith.constant 0 : index
    %c0_1 = arith.constant 0 : index
    %3 = vector.load %arg2[%c0, %c0_1] : memref<16x16xf32, #tpu.memory_space<vmem>>, vector<16x16xf32>
    %c0_2 = arith.constant 0 : index
    %c0_3 = arith.constant 0 : index
    %4 = vector.load %arg3[%c0_2, %c0_3] : memref<16x128xf32, #tpu.memory_space<vmem>>, vector<16x128xf32>
    %cst = arith.constant dense<0.000000e+00> : vector<16x128xf32>
    %5 = tpu.matmul %3, %4, %cst {dimension_numbers = #tpu.dot_dimension_numbers<[1], [0], [0], [1], [0, 0, 1, 1], [], []>} : vector<16x16xf32>, vector<16x128xf32>, vector<16x128xf32> -> vector<16x128xf32>
    %c0_4 = arith.constant 0 : index
    %c0_5 = arith.constant 0 : index
    %6 = vector.load %arg4[%c0_4, %c0_5] : memref<1x128xf32, #tpu.memory_space<vmem>>, vector<1x128xf32>
    %7 = vector.broadcast %6 : vector<1x128xf32> to vector<16x128xf32>
    %8 = arith.addf %5, %7 : vector<16x128xf32>
    %cst_6 = arith.constant 0.000000e+00 : f32
    %9 = vector.broadcast %cst_6 : f32 to vector<16x128xf32>
    %10 = arith.maximumf %8, %9 : vector<16x128xf32>
    %c0_7 = arith.constant 0 : index
    %c0_8 = arith.constant 0 : index
    %11 = vector.load %arg8[%c0_7, %c0_8] : memref<16x128xf32, #tpu.memory_space<vmem>>, vector<16x128xf32>
    %c0_9 = arith.constant 0 : index
    %c0_10 = arith.constant 0 : index
    %12 = vector.load %arg5[%c0_9, %c0_10] : memref<128x128xf32, #tpu.memory_space<vmem>>, vector<128x128xf32>
    %cst_11 = arith.constant dense<0.000000e+00> : vector<16x128xf32>
    %13 = tpu.matmul %10, %12, %cst_11 {dimension_numbers = #tpu.dot_dimension_numbers<[1], [0], [0], [1], [0, 0, 1, 1], [], []>} : vector<16x128xf32>, vector<128x128xf32>, vector<16x128xf32> -> vector<16x128xf32>
    %14 = arith.addf %11, %13 : vector<16x128xf32>
    %c0_12 = arith.constant 0 : index
    %c0_13 = arith.constant 0 : index
    %15 = vector.load %arg8[%c0_12, %c0_13] : memref<16x128xf32, #tpu.memory_space<vmem>>, vector<16x128xf32>
    tpu.vector_store %arg8[%c0_12, %c0_13], %14 {strides = array<i32>} : memref<16x128xf32, #tpu.memory_space<vmem>>, vector<16x128xf32>,
    %c0_i32_14 = arith.constant 0 : i32
    %16 = arith.cmpi eq, %arg1, %c0_i32_14 : i32
    %17 = arith.extui %16 : i1 to i32
    %c0_i32_15 = arith.constant 0 : i32
    %18 = arith.cmpi ne, %17, %c0_i32_15 : i32
    scf.if %18 {
      %c0_16 = arith.constant 0 : index
      %c0_17 = arith.constant 0 : index
      %19 = vector.load %arg8[%c0_16, %c0_17] : memref<16x128xf32, #tpu.memory_space<vmem>>, vector<16x128xf32>
      %c0_18 = arith.constant 0 : index
      %c0_19 = arith.constant 0 : index
      %20 = vector.load %arg6[%c0_18, %c0_19] : memref<1x128xf32, #tpu.memory_space<vmem>>, vector<1x128xf32>
      %21 = vector.broadcast %20 : vector<1x128xf32> to vector<16x128xf32>
      %22 = arith.addf %19, %21 : vector<16x128xf32>
      %c0_20 = arith.constant 0 : index
      %c0_21 = arith.constant 0 : index
      %23 = vector.load %arg7[%c0_20, %c0_21] : memref<16x128xf32, #tpu.memory_space<vmem>>, vector<16x128xf32>
      tpu.vector_store %arg7[%c0_20, %c0_21], %22 {strides = array<i32>} : memref<16x128xf32, #tpu.memory_space<vmem>>, vector<16x128xf32>,
    } else {
    }
    return
  }
  func.func @transform_0(%arg0: i32, %arg1: i32) -> (i32, i32) {
    %c0_i32 = arith.constant 0 : i32
    %c0_i32_0 = arith.constant 0 : i32
    return %arg0, %c0_i32 : i32, i32
  }
  func.func @transform_1(%arg0: i32, %arg1: i32) -> (i32, i32) {
    %c0_i32 = arith.constant 0 : i32
    %c0_i32_0 = arith.constant 0 : i32
    return %c0_i32, %arg1 : i32, i32
  }
  func.func @transform_2(%arg0: i32, %arg1: i32) -> (i32, i32) {
    %c0_i32 = arith.constant 0 : i32
    %c0_i32_0 = arith.constant 0 : i32
    return %c0_i32, %arg1 : i32, i32
  }
  func.func @transform_3(%arg0: i32, %arg1: i32) -> (i32, i32) {
    %c0_i32 = arith.constant 0 : i32
    %c0_i32_0 = arith.constant 0 : i32
    return %arg1, %c0_i32 : i32, i32
  }
  func.func @transform_4(%arg0: i32, %arg1: i32) -> (i32, i32) {
    %c0_i32 = arith.constant 0 : i32
    %c0_i32_0 = arith.constant 0 : i32
    %c0_i32_1 = arith.constant 0 : i32
    return %c0_i32, %c0_i32_0 : i32, i32
  }
  func.func @transform_5(%arg0: i32, %arg1: i32) -> (i32, i32) {
    %c0_i32 = arith.constant 0 : i32
    %c0_i32_0 = arith.constant 0 : i32
    return %arg0, %c0_i32 : i32, i32
  }
}

</mosaic_0001>

<bundles_post_ra>
// kernel: tpu_custom_call.1
= control target key start
LH: loop header
LB: loop body
LE: loop exit
PB: predicated region body
PF: predicated region fallthrough
CT: control target
= control target key end

     0   :  { %10 = vsyncpa [#allocation4], 0  ;;  %s1080_s0 = inlined_call_operand.vmem [shape: f32[64,16], index: 0, kind: input, shape index: {}]   ;;  %s1081_s1 = inlined_call_operand.vmem [shape: f32[16,128], index: 1, kind: input, shape index: {}]   ;;  %s1082_s2 = inlined_call_operand.vmem [shape: f32[1,128], index: 2, kind: input, shape index: {}]   ;;  %s1083_s3 = inlined_call_operand.hbm [shape: f32[128,128], index: 3, kind: input, shape index: {}]   ;;  %s1084_s4 = inlined_call_operand.vmem [shape: f32[1,128], index: 4, kind: input, shape index: {}]   ;;  %s1085_s5 = inlined_call_operand.hbm [shape: f32[64,128], index: 5, kind: output, shape index: {}]  }
   0x1   :  { %11 = vsyncpa [#allocation5], 0 }
   0x2   :  { %13 = vsyncpa [#allocation5 + $0x1], 0  ;;  %s932_s18 = smov 0   ;;  %s934_s19 = smov 0  }
   0x3   :  { %s936_s20 = smov 0   ;;  %s938_s21 = smov 0  }
   0x4   :  { %s940_s22 = smov 0   ;;  %s942_s23 = smov 0  }
   0x5 LB: > { %s632_s24 = sadd.s32 4294967295, %s894_s23   ;;  %s633_s25 = sadd.s32 4294967294, %s894_s23   ;;  %s894_s23 = sphi %s942_s23, %s19_s23   ;;  %s890_s22 = sphi %s940_s22, %s1094_s22   ;;  %s886_s21 = sphi %s938_s21, %s1093_s21   ;;  %s882_s20 = sphi %s936_s20, %s1092_s20   ;;  %s878_s19 = sphi %s934_s19, %s1091_s19   ;;  %s874_s18 = sphi %s932_s18, %s1090_s18  }
   0x6   : > { %s31_s26 = sadd.s32 1, %s890_s22  ;;  %s163_s27 = sadd.s32 1, %s882_s20 }
   0x7   : > { %p33_p0 = scmp.ge.s32.totalorder %s31_s26, 4  ;;  %p173_p1 = scmp.ne.s32.totalorder %s882_s20, %s878_s19 }
   0x8   : > { %p174_p2 = scmp.eq.s32.totalorder %s632_s24, 3  ;;  %p179_p3 = scmp.ne.s32.totalorder %s878_s19, %s874_s18 }
   0x9   : > { %s1096_s26 = smov (%p33_p0, %s31_s26), 0  ;;  %p180_p5 = scmp.eq.s32.totalorder %s633_s25, 3 }
   0xa   : > { %p972_p4 = por %p174_p2, %p173_p1  ;;  %s160_s29 = ssub.s32 %s890_s22, %s1096_s26 }
   0xb   : > { %p634_p6 = scmp.ge.s32.totalorder %s894_s23, 1  ;;  %p161_p7 = scmp.eq.s32.totalorder %s160_s29, 0 }
   0xc   : > { %p979_p8 = por %p180_p5, %p179_p3  ;;  %p187_p9 = scmp.lt.s32.totalorder %s894_s23, 5 }
   0xd   : > { %s985_s6 = scalar_select %p161_p7, %s882_s20, %s163_s27  }
   0xe   : > { %p987_p10 = pnand %p634_p6, %p187_p9  ;;  %p991_p11 = scmp.eq.s32.totalorder %s632_s24, 0 }
   0xf   : > { %s896_s9 = smov [#allocation3]  }
  0x10   : > { %p724_p12 = pneg %p987_p10  ;;  %s215_s10 = sshll.u32 %s896_s9, 4  ;;  %s216_s10 = int_to_ptr.vmem [resolvable:$true] %s215_s10 }
  0x11   : > { %s799_s11 = scalar_lea.vmem %s216_s10, 2048  ;;  %p807_p5 = scmp.lt.s32.totalorder %s216_s10, %s216_s10 }
  0x12   : > { %p725_p13 = pnand %p991_p11, %p724_p12  ;;  %p800_p1 = scmp.ne.s32.totalorder %s216_s10, %s799_s11 }
  0x13   : > { %p808_p6 = scmp.lt.s32.totalorder %s799_s11, %s799_s11 }
  0x14   : > { %p790_p0 = pneg %p725_p13 }
  0x15   : > { %p809_p7 = por %p808_p6, %p807_p5 }
  0x16   : > { %p802_p2 = pnand %p800_p1, %p790_p0 }
  0x18   : > { %p803_p3 = pneg %p802_p2 }
  0x1a   : > { %p810_p9 = pnand %p809_p7, %p803_p3 }
  0x1c   : > { %813 = shalt.err (!%p810_p9)
}
  0x1d   : > { %s897_s12 = smov 128   ;;  %s898_s13 = smov 8  }
  0x1e   : > { %727 = dma.hbm_to_vmem [thread:$0]  (!%p725_p13), %s1083_s3, 2048, %s216_s10, [#allocation4], %s897_s12, %s897_s12, %s898_s13  }
  0x1f   : > { %243 = sbr.rel (%p987_p10) target bundleno = 456 (0x1c8), region = 40 }
  0x24   : > { %865 = dma.done.wait (%p991_p11), [#allocation4], 2048  }
  0x25   : > { %867 = vsyncadd (%p991_p11), [#allocation4], 4294965248  ;;  %s642_s16 = sshll.u32 %s886_s21, 1  ;;  %vm310_vm0 = vcmask 130048   ;;  %v302_v0 = vld [vmem:[%s1081_s1 + $0x8] sm:$0xff]  ;;  %v301_v1 = vld [vmem:[%s1081_s1] sm:$0xff] }
  0x26   : > { %p279_p12 = scmp.lt.s32.totalorder %s642_s16, 7  ;;  %676 = vmatprep.subr.mxu0 %v302_v0  ;;  %v411_v3 = vld [vmem:[#allocation3 + $0x78] sm:$0xff]  ;;  %v410_v4 = vld [vmem:[#allocation3 + $0x70] sm:$0xff]  ;;  %v409_v6 = vld [vmem:[#allocation3 + $0x68] sm:$0xff]  ;;  %s275_s12 = sand.u32 1, %s878_s19  }
  0x27   : > { %677 = vmatpush3.msra.mxu0 %v302_v0  ;;  %683 = vmatprep.subr.mxu1 %v411_v3  ;;  %v408_v7 = vld [vmem:[#allocation3 + $0x60] sm:$0xff]  ;;  %v407_v8 = vld [vmem:[#allocation3 + $0x58] sm:$0xff]  ;;  %v406_v9 = vld [vmem:[#allocation3 + $0x50] sm:$0xff]  ;;  %s641_s13 = sshll.u32 %s275_s12, 4  ;;  %s653_s24 = sshll.u32 %s886_s21, 8 }
  0x28   : > { %s1098_s16 = smov (!%p279_p12, %s642_s16), 7  ;;  %678 = vmatprep.subr.mxu0 %v301_v1  ;;  %684 = vmatpush3.msra.mxu1 %v411_v3  ;;  %v405_v10 = vld [vmem:[#allocation3 + $0x48] sm:$0xff]  ;;  %v404_v11 = vld [vmem:[#allocation3 + $0x40] sm:$0xff]  ;;  %v403_v12 = vld [vmem:[#allocation3 + $0x38] sm:$0xff]  ;;  %s1033_s29 = scalar_lea.hbm %s1085_s5, %s653_s24 }
  0x29   : > { %s643_s17 = sshll.u32 %s1098_s16, 3  ;;  %679 = vmatpush3.msra.mxu0 %v301_v1  ;;  %685 = vmatprep.subr.mxu1 %v410_v4  ;;  %v402_v13 = vld [vmem:[#allocation3 + $0x30] sm:$0xff]  ;;  %v401_v14 = vld [vmem:[#allocation3 + $0x28] sm:$0xff]  ;;  %v400_v15 = vld [vmem:[#allocation3 + $0x20] sm:$0xff]  ;;  %s277_s16 = scalar_lea.vmem [#allocation6], %s641_s13 }
  0x2a   : > { %s282_s27 = scalar_lea.vmem %s1080_s0, %s643_s17  ;;  %686 = vmatpush3.msra.mxu1 %v410_v4  ;;  %v399_v16 = vld [vmem:[#allocation3 + $0x18] sm:$0xff]  ;;  %v398_v17 = vld [vmem:[#allocation3 + $0x10] sm:$0xff]  ;;  %v397_v18 = vld [vmem:[#allocation3 + $0x8] sm:$0xff]  ;;  %s521_s17 = sshll.u32 %s277_s16, 4  ;;  %s1028_s17 = int_to_ptr.vmem [resolvable:$true] %s521_s17 }
  0x2b   : > { %v299_v2 = vld [vmem:[%s282_s27] sm:$0xff]  ;;  %v300_v5 = vld [vmem:[%s282_s27 + $0x8] sm:$0xff]  ;;  %687 = vmatprep.subr.mxu1 %v409_v6  ;;  %s1035_s9 = scalar_lea.sflag [#allocation5], %s275_s12  ;;  %s814_s7 = scalar_lea.vmem %s1028_s17, 256 }
  0x2c   : > { %680 = vmatprep.mubr.msk.f32.mxu0 %vm310_vm0, %v299_v2  ;;  %688 = vmatpush3.msra.mxu1 %v409_v6  ;;  %v396_v19 = vld [vmem:[#allocation3] sm:$0xff]  ;;  %p815_p10 = scmp.ne.s32.totalorder %s1028_s17, %s814_s7  ;;  %s899_s21 = smov [#allocation6]  }
  0x2d   : > { %681 = vmatmul.mubr.msk.f32.vlgmr.msra.gmra.mxu0 %vm310_vm0, %v300_v5  ;;  %689 = vmatprep.subr.mxu1 %v408_v7  ;;  %v644_v20 = vld [vmem:[%s1082_s2] ss:$0 sm:$0xff]  ;;  %s818_s10 = sshll.u32 %s899_s21, 4  ;;  %s819_s10 = int_to_ptr.vmem [resolvable:$false] %s818_s10 }
  0x2e   : > { %690 = vmatpush3.msra.mxu1 %v408_v7  ;;  %v647_v27 = vld [vmem:[%s1084_s4] ss:$0 sm:$0xff]  ;;  %p816_p11 = pnand %p815_p10, %p972_p4  ;;  %s820_s8 = scalar_lea.vmem %s819_s10, 512 }
  0x2f   : > { %691 = vmatprep.subr.mxu1 %v407_v8  ;;  %p821_p0 = scmp.lt.s32.totalorder %s1028_s17, %s819_s10  ;;  %p822_p1 = scmp.lt.s32.totalorder %s820_s8, %s814_s7 }
  0x30   : > { %692 = vmatpush3.msra.mxu1 %v407_v8  ;;  %p817_p13 = pneg %p816_p11 }
  0x31   : > { %693 = vmatprep.subr.mxu1 %v406_v9  ;;  %p823_p2 = por %p822_p1, %p821_p0 }
  0x32   : > { %694 = vmatpush3.msra.mxu1 %v406_v9 }
  0x33   : > { %695 = vmatprep.subr.mxu1 %v405_v10  ;;  %p824_p3 = pnand %p823_p2, %p817_p13 }
  0x34   : > { %696 = vmatpush3.msra.mxu1 %v405_v10 }
  0x35   : > { %697 = vmatprep.subr.mxu1 %v404_v11 }
  0x36   : > { %698 = vmatpush3.msra.mxu1 %v404_v11 }
  0x37   : > { %699 = vmatprep.subr.mxu1 %v403_v12 }
  0x38   : > { %700 = vmatpush3.msra.mxu1 %v403_v12 }
  0x39   : > { %701 = vmatprep.subr.mxu1 %v402_v13 }
  0x3a   : > { %702 = vmatpush3.msra.mxu1 %v402_v13 }
  0x3b   : > { %703 = vmatprep.subr.mxu1 %v401_v14 }
  0x3c   : > { %704 = vmatpush3.msra.mxu1 %v401_v14 }
  0x3d   : > { %705 = vmatprep.subr.mxu1 %v400_v15 }
  0x3e   : > { %706 = vmatpush3.msra.mxu1 %v400_v15 }
  0x3f   : > { %707 = vmatprep.subr.mxu1 %v399_v16 }
  0x40   : > { %708 = vmatpush3.msra.mxu1 %v399_v16 }
  0x41   : > { %709 = vmatprep.subr.mxu1 %v398_v17 }
  0x42   : > { %710 = vmatpush3.msra.mxu1 %v398_v17 }
  0x43   : > { %711 = vmatprep.subr.mxu1 %v397_v18 }
  0x44   : > { %712 = vmatpush3.msra.mxu1 %v397_v18 }
  0x45   : > { %713 = vmatprep.subr.mxu1 %v396_v19 }
  0x46   : > { %714 = vmatpush3.msra.mxu1 %v396_v19 }
  0xed   : > { %v682_v21 = vpop.f32.mrf.mxu0 }
  0xee   : > { %v389_v22 = vadd.f32 %v682_v21, %v644_v20 }
  0xef   : > { %v383_v23 = vpop.f32.mrf.mxu0 }
  0xf0   : > { %v384_v24 = vadd.f32 %v644_v20, %v383_v23  ;;  %v393_v26 = vmax.f32 %v389_v22, 0.0 }
  0xf2   : > { %v392_v25 = vmax.f32 %v384_v24, 0.0 }
  0xf4   : > { %715 = vmatprep.mubr.f32.mxu1 %v392_v25 }
  0xf5   : > { %716 = vmatmul.mubr.f32.vlgmr.msra.gmra.mxu1 %v393_v26 }
 0x1b5   : > { %v717_v28 = vpop.f32.mrf.mxu1 }
 0x1b6   : > { %v504_v29 = vadd.f32 %v717_v28, %v647_v27 }
 0x1b7   : > { %v478_v30 = vpop.f32.mrf.mxu1 }
 0x1b8   : > { %506 = vst [vmem:[%s277_s16 + $0x8] sm:$0xff] %v504_v29  ;;  %v503_v31 = vadd.f32 %v647_v27, %v478_v30 }
 0x1ba   : > { %505 = vst [vmem:[%s277_s16] sm:$0xff] %v503_v31 }
 0x1bb   : > { %827 = shalt.err (!%p824_p3)
}
 0x1bc   : > { %s828_s11 = scalar_lea.hbm %s1033_s29, 256  ;;  %s832_s14 = scalar_lea.hbm %s1085_s5, 1024 }
 0x1bd   : > { %p829_p5 = scmp.ne.s32.totalorder %s1033_s29, %s828_s11  ;;  %p833_p9 = scmp.lt.s32.totalorder %s1033_s29, %s1085_s5 }
 0x1be   : > { %p834_p12 = scmp.lt.s32.totalorder %s832_s14, %s828_s11 }
 0x1bf   : > { %p830_p6 = pnand %p829_p5, %p972_p4 }
 0x1c0   : > { %p835_p10 = por %p834_p12, %p833_p9 }
 0x1c1   : > { %p831_p7 = pneg %p830_p6 }
 0x1c3   : > { %p836_p11 = pnand %p835_p10, %p831_p7 }
 0x1c5   : > { %839 = shalt.err (!%p836_p11)
}
 0x1c6   : > { %s900_s24 = smov 128   ;;  %s901_s25 = smov 8  }
 0x1c7   : > { %722 = dma.vmem_to_hbm [thread:$0]  (%p972_p4), %s1028_s17, 256, %s1033_s29, %s1035_s9, %s900_s24, %s900_s24, %s901_s25  }
 0x1c8 PF: > { %p734_p13 = scmp.ge.s32.totalorder %s894_s23, 2  ;;  %s536_s27 = sand.u32 1, %s874_s18  }
 0x1c9   : > { %s537_s7 = scalar_lea.sflag [#allocation5], %s536_s27 }
 0x1ca   : > { %p729_p0 = pnand %p734_p13, %p979_p8 }
 0x1cc   : > { %p730_p1 = pneg %p729_p0 }
 0x1ce   : > { %869 = dma.done.wait (%p730_p1), %s537_s7, 256  }
 0x1cf   : > { %871 = vsyncadd (%p730_p1), %s537_s7, 4294967040  ;;  %s19_s23 = sadd.s32 1, %s894_s23   ;;  %s1090_s18 = smov %s878_s19 }
 0x1d0   : > { %p16_p2 = scmp.ge.s32.totalorder %s19_s23, 6   ;;  %s1091_s19 = smov %s882_s20 }
 0x1d1   : > { %s1092_s20 = smov %s985_s6  ;;  %s1093_s21 = smov %s890_s22 }
 0x1d2   : > { %s1094_s22 = smov %s1096_s26  ;;  %18 = sbr.rel (!%p16_p2) target bundleno = 5 (0x5), region = 95 }
 0x1d7   :  { %542 = vsyncpa [#allocation4], 1 }
 0x1d8   :  { %544 = vsyncpa [#allocation4 + $0x1], 1 }
 0x1d9   :  { %545 = vsyncpa [#allocation5], 1 }
 0x1da   :  { %547 = vsyncpa [#allocation5 + $0x1], 1 }

</bundles_post_ra>
